<compile_context>
chip_gen: v5e
topology: v5e:2x2
jax: 0.10.0
libtpu: 0.0.40
codegen_flags: <defaults>
</compile_context>

<pallas_src>
import jax
import jax.numpy as jnp
from jax.experimental import pallas as pl
from jax.experimental.pallas import tpu as pltpu


def _round_up(x, m):
    return ((x + m - 1) // m) * m


def _pick_tile(padded_dim, preferred, align):
    """Largest multiple of `align` that divides `padded_dim`, capped at
    `preferred`. `padded_dim` must itself be a multiple of `align`."""
    t = min(preferred, padded_dim)
    t -= t % align
    while t > align and padded_dim % t != 0:
        t -= align
    return max(t, align)


def _dense_kernel_accum_out(x_ref, wt_ref, b_ref, o_ref):
    """f32-output path: accumulate straight into the resident output block
    (its block index is constant across the k axis), no VMEM scratch."""
    k = pl.program_id(2)

    @pl.when(k == 0)
    def _():
        o_ref[...] = jnp.zeros_like(o_ref)

    o_ref[...] += jnp.dot(
        x_ref[...], wt_ref[...], preferred_element_type=jnp.float32
    )

    @pl.when(k == pl.num_programs(2) - 1)
    def _():
        o_ref[...] += b_ref[...].astype(o_ref.dtype)


def _dense_kernel_scratch(x_ref, wt_ref, b_ref, o_ref, acc_ref):
    """Low-precision-output path: f32 VMEM scratch accumulator, single cast."""
    k = pl.program_id(2)

    @pl.when(k == 0)
    def _():
        acc_ref[...] = jnp.zeros_like(acc_ref)

    acc_ref[...] += jnp.dot(
        x_ref[...], wt_ref[...], preferred_element_type=jnp.float32
    )

    @pl.when(k == pl.num_programs(2) - 1)
    def _():
        o_ref[...] = (acc_ref[...] + b_ref[...]).astype(o_ref.dtype)


def prepare_dense_params(weight, bias, *, operand_dtype=None):
    """Fold the nn.Linear parameter transform into the frozen params ONCE.

    weight : (output_dim, input_dim)  -- PyTorch nn.Linear layout
    bias   : (output_dim,)
    Returns (w_t_padded, b_padded, output_dim) where
      w_t_padded : (K_pad, N_pad), K_pad = round_up(input_dim, 128),
                                   N_pad = round_up(output_dim, 128)
      b_padded   : (1, N_pad) float32
    Zero-padding K contributes nothing to the dot, and the padded N columns
    are sliced off in dense_forward, so semantics are exact.
    """
    out_dim, in_dim = weight.shape
    k_pad = _round_up(in_dim, 128)
    n_pad = _round_up(out_dim, 128)

    w_t = jnp.asarray(weight).T  # (in_dim, out_dim)
    if operand_dtype is not None:
        w_t = w_t.astype(operand_dtype)
    w_t = jnp.pad(w_t, ((0, k_pad - in_dim), (0, n_pad - out_dim)))

    b = jnp.pad(jnp.asarray(bias, jnp.float32), (0, n_pad - out_dim))
    return w_t, b.reshape(1, n_pad), out_dim


def dense_forward(x, w_t_padded, b_padded, output_dim, *,
                  operand_dtype=None, tm=512, tn=1024, tk=512):
    """Pallas Dense forward: (x @ W.T + b)[..., None, None].

    x          : (B, input_dim)
    w_t_padded : (K_pad, N_pad) from prepare_dense_params
    b_padded   : (1, N_pad)
    returns (B, output_dim, 1, 1)
    """
    out_dtype = x.dtype
    B, K = x.shape
    K_pad, N_pad = w_t_padded.shape
    assert K <= K_pad, (K, K_pad)
    assert b_padded.shape == (1, N_pad), b_padded.shape

    if operand_dtype is not None:
        x = x.astype(operand_dtype)

    # Sublane packing: 8 rows per vreg for 4-byte operands, 16 for bf16.
    sublane = 8 if jnp.dtype(x.dtype).itemsize == 4 else 16
    B_pad = _round_up(B, sublane)
    if (B_pad, K_pad) != (B, K):
        x = jnp.pad(x, ((0, B_pad - B), (0, K_pad - K)))

    # Tile selection: prefer 256-multiples on the MXU dims (v6e/v7x are
    # 256-wide), fall back to 128; dims are padded so division is exact.
    tm = _pick_tile(B_pad, tm, sublane)
    tn = _pick_tile(N_pad, tn, 256 if N_pad % 256 == 0 else 128)
    tk = _pick_tile(K_pad, tk, 256 if K_pad % 256 == 0 else 128)

    # v7x has 2 TensorCores: keep at least one parallel axis with extent >= 2
    # when the problem allows it.
    if B_pad // tm == 1 and N_pad // tn == 1 and N_pad >= 256:
        tn = _pick_tile(N_pad, N_pad // 2, 128)

    grid = (B_pad // tm, N_pad // tn, K_pad // tk)

    use_scratch = jnp.dtype(out_dtype) != jnp.float32
    kernel = _dense_kernel_scratch if use_scratch else _dense_kernel_accum_out
    scratch = [pltpu.VMEM((tm, tn), jnp.float32)] if use_scratch else []

    itemsize = jnp.dtype(x.dtype).itemsize
    cost = pl.CostEstimate(
        flops=2 * B_pad * N_pad * K_pad,
        bytes_accessed=(itemsize * B_pad * K_pad
                        + jnp.dtype(w_t_padded.dtype).itemsize * K_pad * N_pad
                        + 4 * N_pad
                        + jnp.dtype(out_dtype).itemsize * B_pad * N_pad),
        transcendentals=0,
    )

    out2d = pl.pallas_call(
        kernel,
        out_shape=jax.ShapeDtypeStruct((B_pad, N_pad), out_dtype),
        grid_spec=pltpu.PrefetchScalarGridSpec(
            num_scalar_prefetch=0,
            grid=grid,
            in_specs=[
                pl.BlockSpec((tm, tk), lambda i, j, k: (i, k)),
                pl.BlockSpec((tk, tn), lambda i, j, k: (k, j)),
                pl.BlockSpec((1, tn), lambda i, j, k: (0, j)),
            ],
            out_specs=pl.BlockSpec((tm, tn), lambda i, j, k: (i, j)),
            scratch_shapes=scratch,
        ),
        compiler_params=pltpu.CompilerParams(
            dimension_semantics=("parallel", "parallel", "arbitrary"),
            vmem_limit_bytes=32 * 1024 * 1024,
        ),
        cost_estimate=cost,
    )(x, w_t_padded, b_padded)

    # Slice off the padding, then append the singleton feature-map dims as a
    # pure metadata reshape (kernel out_spec stays lane-dense).
    return out2d[:B, :output_dim].reshape(B, output_dim, 1, 1)


if __name__ == "__main__":
    key = jax.random.PRNGKey(0)
    k_x, k_w, k_b = jax.random.split(key, 3)

    batch, input_dim, output_dim = 2, 32, 64

    # nn.Linear parameters (PyTorch layout: weight (out, in), bias (out,)).
    W = jax.random.normal(k_w, (output_dim, input_dim), dtype=jnp.float32) * 0.1
    b = jax.random.normal(k_b, (output_dim,), dtype=jnp.float32) * 0.1
    x = jax.random.normal(k_x, (batch, input_dim), dtype=jnp.float32)

    # Frozen-parameter fold: transpose + zero-pad ONCE at init.
    # (For v6e/v7x deployments pass operand_dtype=jnp.bfloat16 here and in
    #  dense_forward for ~2x MXU throughput with f32 accumulation.)
    W_t_p, b_p, n_out = prepare_dense_params(W, b)

    out = dense_forward(x, W_t_p, b_p, n_out)
    out = jax.block_until_ready(out)

    # Pure-JAX reference: self.dense(x)[..., None, None]
    ref = (x @ W.T + b)[..., None, None]
    assert out.shape == (batch, output_dim, 1, 1), out.shape
    assert jnp.allclose(out, ref, atol=1e-5, rtol=1e-5)

    print("KERNEL_OK")
</pallas_src>

<mosaic_0001>
module attributes {stable_mosaic.version = 11 : i64} {
  func.func @_dense_kernel_accum_out(%arg0: i32, %arg1: i32, %arg2: i32, %arg3: memref<8x128xf32, #tpu.memory_space<vmem>>, %arg4: memref<128x128xf32, #tpu.memory_space<vmem>>, %arg5: memref<1x128xf32, #tpu.memory_space<vmem>>, %arg6: memref<8x128xf32, #tpu.memory_space<vmem>>) attributes {dimension_semantics = [#tpu.dimension_semantics<parallel>, #tpu.dimension_semantics<parallel>, #tpu.dimension_semantics<arbitrary>], iteration_bounds = array<i64: 1, 1, 1>, scalar_prefetch = 0 : i64, scratch_operands = 0 : i64, tpu.core_type = #tpu.core_type<tc>, window_params = [{transform_indices = @transform_0, window_bounds = array<i64: 8, 128>}, {transform_indices = @transform_1, window_bounds = array<i64: 128, 128>}, {transform_indices = @transform_2, window_bounds = array<i64: 1, 128>}, {transform_indices = @transform_3, window_bounds = array<i64: 8, 128>}]} {
    %c0_i32 = arith.constant 0 : i32
    %0 = arith.cmpi eq, %arg2, %c0_i32 : i32
    %1 = arith.extui %0 : i1 to i32
    %c0_i32_0 = arith.constant 0 : i32
    %2 = arith.cmpi ne, %1, %c0_i32_0 : i32
    scf.if %2 {
      %cst_10 = arith.constant 0.000000e+00 : f32
      %12 = vector.broadcast %cst_10 : f32 to vector<8x128xf32>
      %c0_11 = arith.constant 0 : index
      %c0_12 = arith.constant 0 : index
      %13 = vector.load %arg6[%c0_11, %c0_12] : memref<8x128xf32, #tpu.memory_space<vmem>>, vector<8x128xf32>
      tpu.vector_store %arg6[%c0_11, %c0_12], %12 {strides = array<i32>} : memref<8x128xf32, #tpu.memory_space<vmem>>, vector<8x128xf32>,
    } else {
    }
    %c0 = arith.constant 0 : index
    %c0_1 = arith.constant 0 : index
    %3 = vector.load %arg6[%c0, %c0_1] : memref<8x128xf32, #tpu.memory_space<vmem>>, vector<8x128xf32>
    %c0_2 = arith.constant 0 : index
    %c0_3 = arith.constant 0 : index
    %4 = vector.load %arg3[%c0_2, %c0_3] : memref<8x128xf32, #tpu.memory_space<vmem>>, vector<8x128xf32>
    %c0_4 = arith.constant 0 : index
    %c0_5 = arith.constant 0 : index
    %5 = vector.load %arg4[%c0_4, %c0_5] : memref<128x128xf32, #tpu.memory_space<vmem>>, vector<128x128xf32>
    %cst = arith.constant dense<0.000000e+00> : vector<8x128xf32>
    %6 = tpu.matmul %4, %5, %cst {dimension_numbers = #tpu.dot_dimension_numbers<[1], [0], [0], [1], [0, 0, 1, 1], [], []>} : vector<8x128xf32>, vector<128x128xf32>, vector<8x128xf32> -> vector<8x128xf32>
    %7 = arith.addf %3, %6 : vector<8x128xf32>
    %c0_6 = arith.constant 0 : index
    %c0_7 = arith.constant 0 : index
    %8 = vector.load %arg6[%c0_6, %c0_7] : memref<8x128xf32, #tpu.memory_space<vmem>>, vector<8x128xf32>
    tpu.vector_store %arg6[%c0_6, %c0_7], %7 {strides = array<i32>} : memref<8x128xf32, #tpu.memory_space<vmem>>, vector<8x128xf32>,
    %c0_i32_8 = arith.constant 0 : i32
    %9 = arith.cmpi eq, %arg2, %c0_i32_8 : i32
    %10 = arith.extui %9 : i1 to i32
    %c0_i32_9 = arith.constant 0 : i32
    %11 = arith.cmpi ne, %10, %c0_i32_9 : i32
    scf.if %11 {
      %c0_10 = arith.constant 0 : index
      %c0_11 = arith.constant 0 : index
      %12 = vector.load %arg6[%c0_10, %c0_11] : memref<8x128xf32, #tpu.memory_space<vmem>>, vector<8x128xf32>
      %c0_12 = arith.constant 0 : index
      %c0_13 = arith.constant 0 : index
      %13 = vector.load %arg5[%c0_12, %c0_13] : memref<1x128xf32, #tpu.memory_space<vmem>>, vector<1x128xf32>
      %14 = vector.broadcast %13 : vector<1x128xf32> to vector<8x128xf32>
      %15 = arith.addf %12, %14 : vector<8x128xf32>
      %c0_14 = arith.constant 0 : index
      %c0_15 = arith.constant 0 : index
      %16 = vector.load %arg6[%c0_14, %c0_15] : memref<8x128xf32, #tpu.memory_space<vmem>>, vector<8x128xf32>
      tpu.vector_store %arg6[%c0_14, %c0_15], %15 {strides = array<i32>} : memref<8x128xf32, #tpu.memory_space<vmem>>, vector<8x128xf32>,
    } else {
    }
    return
  }
  func.func @transform_0(%arg0: i32, %arg1: i32, %arg2: i32) -> (i32, i32) {
    %c0_i32 = arith.constant 0 : i32
    return %arg0, %arg2 : i32, i32
  }
  func.func @transform_1(%arg0: i32, %arg1: i32, %arg2: i32) -> (i32, i32) {
    %c0_i32 = arith.constant 0 : i32
    return %arg2, %arg1 : i32, i32
  }
  func.func @transform_2(%arg0: i32, %arg1: i32, %arg2: i32) -> (i32, i32) {
    %c0_i32 = arith.constant 0 : i32
    %c0_i32_0 = arith.constant 0 : i32
    return %c0_i32, %arg1 : i32, i32
  }
  func.func @transform_3(%arg0: i32, %arg1: i32, %arg2: i32) -> (i32, i32) {
    %c0_i32 = arith.constant 0 : i32
    return %arg0, %arg1 : i32, i32
  }
}

</mosaic_0001>

<bundles_post_ra>
// kernel: tpu_custom_call.1
= control target key start
LH: loop header
LB: loop body
LE: loop exit
PB: predicated region body
PF: predicated region fallthrough
CT: control target
= control target key end

     0   :  { %8 = vsyncpa [#allocation3], 0  ;;  %s240_s0 = inlined_call_operand.hbm [shape: f32[8,128], index: 0, kind: input, shape index: {}]   ;;  %s241_s1 = inlined_call_operand.hbm [shape: f32[128,128], index: 1, kind: input, shape index: {}]   ;;  %s242_s2 = inlined_call_operand.vmem [shape: f32[1,128], index: 2, kind: input, shape index: {}]   ;;  %s243_s3 = inlined_call_operand.hbm [shape: f32[8,128], index: 3, kind: output, shape index: {}]  }
   0x1   :  { %9 = vsyncpa [#allocation6], 0 }
   0x2   :  { %10 = vsyncpa [#allocation4], 0  ;;  %s16_s14 = sshll.u32 %s240_s0, 4  ;;  %s203_s15 = smov [#allocation2]   ;;  %s17_s14 = int_to_ptr.hbm [resolvable:$true] %s16_s14 }
   0x3   :  { %s18_s16 = sshll.u32 %s203_s15, 4  ;;  %s26_s19 = sshll.u32 %s241_s1, 4  ;;  %s19_s16 = int_to_ptr.vmem [resolvable:$true] %s18_s16  ;;  %s27_s19 = int_to_ptr.hbm [resolvable:$true] %s26_s19 }
   0x4   :  { %21 = dma.hbm_to_vmem [thread:$0]  %s17_s14, 128, %s19_s16, [#allocation3]  }
   0x5   :  { %s204_s20 = smov [#allocation5]   ;;  %s205_s22 = smov 128  }
   0x6   :  { %s28_s21 = sshll.u32 %s204_s20, 4  ;;  %s206_s23 = smov 8   ;;  %s29_s21 = int_to_ptr.vmem [resolvable:$true] %s28_s21 }
   0x7   :  { %34 = dma.hbm_to_vmem [thread:$0]  %s27_s19, 2048, %s29_s21, [#allocation6], %s205_s22, %s205_s22, %s206_s23  }
   0x8   :  { %197 = dma.done.wait [#allocation3], 128  }
   0x9   :  { %198 = vsyncadd [#allocation3], 4294967168 }
   0xa   :  { %199 = dma.done.wait [#allocation6], 2048  }
   0xb   :  { %200 = vsyncadd [#allocation6], 4294965248  ;;  %v67_v0 = vld [vmem:[#allocation5 + $0x78] sm:$0xff]  ;;  %v66_v1 = vld [vmem:[#allocation5 + $0x70] sm:$0xff]  ;;  %s207_s24 = smov [#allocation7]   ;;  %s107_s28 = sshll.u32 %s243_s3, 4  ;;  %s108_s28 = int_to_ptr.hbm [resolvable:$true] %s107_s28 }
   0xc   :  { %68 = vmatpush.msra.mxu0 %v67_v0  ;;  %v65_v2 = vld [vmem:[#allocation5 + $0x68] sm:$0xff]  ;;  %v64_v3 = vld [vmem:[#allocation5 + $0x60] sm:$0xff]  ;;  %v63_v4 = vld [vmem:[#allocation5 + $0x58] sm:$0xff]  ;;  %s105_s25 = sshll.u32 %s207_s24, 4  ;;  %s106_s25 = int_to_ptr.vmem [resolvable:$true] %s105_s25 }
   0xd   :  { %v62_v5 = vld [vmem:[#allocation5 + $0x50] sm:$0xff]  ;;  %v61_v6 = vld [vmem:[#allocation5 + $0x48] sm:$0xff]  ;;  %v60_v7 = vld [vmem:[#allocation5 + $0x40] sm:$0xff] }
   0xe   :  { %69 = vmatpush.msra.mxu0 %v66_v1  ;;  %v59_v8 = vld [vmem:[#allocation5 + $0x38] sm:$0xff]  ;;  %v58_v9 = vld [vmem:[#allocation5 + $0x30] sm:$0xff]  ;;  %v57_v10 = vld [vmem:[#allocation5 + $0x28] sm:$0xff] }
   0xf   :  { %v56_v11 = vld [vmem:[#allocation5 + $0x20] sm:$0xff]  ;;  %v55_v12 = vld [vmem:[#allocation5 + $0x18] sm:$0xff]  ;;  %v54_v13 = vld [vmem:[#allocation5 + $0x10] sm:$0xff] }
  0x10   :  { %70 = vmatpush.msra.mxu0 %v65_v2  ;;  %v53_v14 = vld [vmem:[#allocation5 + $0x8] sm:$0xff]  ;;  %v52_v15 = vld [vmem:[#allocation5] sm:$0xff]  ;;  %v51_v16 = vld [vmem:[#allocation2] sm:$0xff] }
  0x11   :  { %v124_v17 = vld [vmem:[%s242_s2] ss:$0 sm:$0xff] }
  0x12   :  { %71 = vmatpush.msra.mxu0 %v64_v3 }
  0x14   :  { %72 = vmatpush.msra.mxu0 %v63_v4 }
  0x16   :  { %73 = vmatpush.msra.mxu0 %v62_v5 }
  0x18   :  { %74 = vmatpush.msra.mxu0 %v61_v6 }
  0x1a   :  { %75 = vmatpush.msra.mxu0 %v60_v7 }
  0x1c   :  { %76 = vmatpush.msra.mxu0 %v59_v8 }
  0x1e   :  { %77 = vmatpush.msra.mxu0 %v58_v9 }
  0x20   :  { %78 = vmatpush.msra.mxu0 %v57_v10 }
  0x22   :  { %79 = vmatpush.msra.mxu0 %v56_v11 }
  0x24   :  { %80 = vmatpush.msra.mxu0 %v55_v12 }
  0x26   :  { %81 = vmatpush.msra.mxu0 %v54_v13 }
  0x28   :  { %82 = vmatpush.msra.mxu0 %v53_v14 }
  0x2a   :  { %83 = vmatpush.msra.mxu0 %v52_v15 }
  0x2b   :  { %84 = vmatmul.f32.vlgmr.msra.gmra.mxu0 %v51_v16 }
  0xa8   :  { %v85_v18 = vpop.f32.mrf.mxu0 }
  0xa9   :  { %v98_v19 = vadd.f32 %v124_v17, %v85_v18 }
  0xab   :  { %99 = vst [vmem:[#allocation7] sm:$0xff] %v98_v19 }
  0xac   :  { %110 = dma.vmem_to_hbm [thread:$0]  %s106_s25, 128, %s108_s28, [#allocation4]  }
  0xad   :  { %201 = dma.done.wait [#allocation4], 128  }
  0xae   :  { %202 = vsyncadd [#allocation4], 4294967168 }
  0xaf   :  { %115 = vsyncpa [#allocation3], 1 }
  0xb0   :  { %116 = vsyncpa [#allocation6], 1 }
  0xb1   :  { %117 = vsyncpa [#allocation4], 1 }

</bundles_post_ra>
